<compile_context>
chip_gen: v7x
topology: tpu7x:2x2x1
jax: 0.10.0
libtpu: 0.0.40
codegen_flags: <defaults>
</compile_context>

<pallas_src>
import jax
import jax.numpy as jnp
from jax import lax
from jax.experimental import pallas as pl
from jax.experimental.pallas import tpu as pltpu

EPS = 1e-5
VMEM_LIMIT = 32 * 1024 * 1024  # conservative: <= scoped default on v6e/v7x, raises v5e


def _row_tile(rows: int, max_rows: int = 1024) -> int:
    """Full array if small; otherwise the largest divisor that is a multiple of 8."""
    if rows <= max_rows:
        return rows
    for t in (1024, 512, 256, 128, 64, 32, 16, 8):
        if t <= max_rows and rows % t == 0:
            return t
    return rows


def _col_tile(cols: int, max_cols: int = 512) -> int:
    """Full if small; otherwise the largest divisor that is a multiple of 128."""
    if cols <= max_cols:
        return cols
    for t in (512, 384, 256, 128):
        if cols % t == 0:
            return t
    return cols


# ---------------------------------------------------------------------------
# BatchNorm statistics -> folded per-channel (scale, shift)
# ---------------------------------------------------------------------------
def bn_fold_stats(x2d, gamma, beta):
    """x2d: (R, C).  Returns (scale, shift), each (1, C) f32, such that
    BN_train(x) == x * scale + shift  (biased variance, eps=1e-5)."""
    R, C = x2d.shape
    tm = _row_tile(R)
    inv_n = 1.0 / float(R)

    def kernel(x_ref, g_ref, b_ref, scale_ref, shift_ref, sum_sc, sq_sc):
        @pl.when(pl.program_id(0) == 0)
        def _():
            sum_sc[...] = jnp.zeros_like(sum_sc)
            sq_sc[...] = jnp.zeros_like(sq_sc)

        x = x_ref[...].astype(jnp.float32)
        sum_sc[...] += jnp.sum(x, axis=0, keepdims=True)
        sq_sc[...] += jnp.sum(x * x, axis=0, keepdims=True)

        @pl.when(pl.program_id(0) == pl.num_programs(0) - 1)
        def _():
            mean = sum_sc[...] * inv_n
            var = jnp.maximum(sq_sc[...] * inv_n - mean * mean, 0.0)
            rstd = lax.rsqrt(var + EPS)          # EUP, no divide
            scale = g_ref[...] * rstd
            scale_ref[...] = scale
            shift_ref[...] = b_ref[...] - mean * scale

    g2 = gamma.reshape(1, C).astype(jnp.float32)
    b2 = beta.reshape(1, C).astype(jnp.float32)
    return pl.pallas_call(
        kernel,
        out_shape=(jax.ShapeDtypeStruct((1, C), jnp.float32),
                   jax.ShapeDtypeStruct((1, C), jnp.float32)),
        grid_spec=pltpu.PrefetchScalarGridSpec(
            num_scalar_prefetch=0,
            grid=(R // tm,),
            in_specs=[
                pl.BlockSpec((tm, C), lambda i: (i, 0)),
                pl.BlockSpec((1, C), lambda i: (0, 0)),
                pl.BlockSpec((1, C), lambda i: (0, 0)),
            ],
            out_specs=[
                pl.BlockSpec((1, C), lambda i: (0, 0)),
                pl.BlockSpec((1, C), lambda i: (0, 0)),
            ],
            scratch_shapes=[pltpu.VMEM((1, C), jnp.float32),
                            pltpu.VMEM((1, C), jnp.float32)],
        ),
        compiler_params=pltpu.CompilerParams(
            dimension_semantics=("arbitrary",),
            vmem_limit_bytes=VMEM_LIMIT),
    )(x2d, g2, b2)


# ---------------------------------------------------------------------------
# Fused BN1-apply + multi-head self-attention + output projection + BN2 stats
# ---------------------------------------------------------------------------
def attention_bn2(x, scale1, shift1, wq, wk, wv, bq, bk, bv, wp, bproj,
                  gamma2, beta2, *, num_heads):
    """x: (B, N, C).  wq/wk/wv: (H, C, hd) bf16; bq/bk/bv: (H, 1, hd) f32;
    wp: (H, hd, C) bf16; bproj/gamma2/beta2: (1, C) f32.
    Returns (a, scale2, shift2): attention output and folded BN2 params."""
    B, N, C = x.shape
    hd = C // num_heads
    sm_scale = float(hd) ** -0.5
    inv_r = 1.0 / float(B * N)

    def kernel(x_ref, sc_ref, sh_ref, wq_ref, wk_ref, wv_ref,
               bq_ref, bk_ref, bv_ref, wp_ref, bp_ref, g2_ref, b2_ref,
               o_ref, sc2_ref, sh2_ref,
               zb_sc, acc_sc, sum_sc, sq_sc):
        b = pl.program_id(0)
        h = pl.program_id(1)

        @pl.when((b == 0) & (h == 0))
        def _():
            sum_sc[...] = jnp.zeros_like(sum_sc)
            sq_sc[...] = jnp.zeros_like(sq_sc)

        @pl.when(h == 0)
        def _():
            acc_sc[...] = jnp.zeros_like(acc_sc)
            # Folded BN1 apply (f32 FMA), cached once per batch element.
            z = x_ref[0].astype(jnp.float32) * sc_ref[...] + sh_ref[...]
            zb_sc[...] = z.astype(jnp.bfloat16)

        zb = zb_sc[...]                                        # (N, C) bf16
        # Per-head projections from heads-major weight slabs (bf16 MXU, f32 acc).
        q = jnp.dot(zb, wq_ref[0], preferred_element_type=jnp.float32) + bq_ref[0]
        k = jnp.dot(zb, wk_ref[0], preferred_element_type=jnp.float32) + bk_ref[0]
        v = jnp.dot(zb, wv_ref[0], preferred_element_type=jnp.float32) + bv_ref[0]

        s = lax.dot_general(q.astype(jnp.bfloat16), k.astype(jnp.bfloat16),
                            (((1,), (1,)), ((), ())),
                            preferred_element_type=jnp.float32) * sm_scale  # (N, N)
        m = jnp.max(s, axis=-1, keepdims=True)
        e = jnp.exp(s - m)
        p = e * pl.reciprocal(jnp.sum(e, axis=-1, keepdims=True), approx=True)
        o_h = jnp.dot(p.astype(jnp.bfloat16), v.astype(jnp.bfloat16),
                      preferred_element_type=jnp.float32)                    # (N, hd)
        # Accumulate the output projection per head in a VMEM scratch.
        acc_sc[...] += jnp.dot(o_h.astype(jnp.bfloat16), wp_ref[0],
                               preferred_element_type=jnp.float32)

        @pl.when(h == pl.num_programs(1) - 1)
        def _():
            a = acc_sc[...] + bp_ref[...]
            o_ref[0] = a.astype(o_ref.dtype)
            # Fused BN2 statistics (saves one HBM pass over `a`).
            sum_sc[...] += jnp.sum(a, axis=0, keepdims=True)
            sq_sc[...] += jnp.sum(a * a, axis=0, keepdims=True)

        @pl.when((h == pl.num_programs(1) - 1) & (b == pl.num_programs(0) - 1))
        def _():
            mean = sum_sc[...] * inv_r
            var = jnp.maximum(sq_sc[...] * inv_r - mean * mean, 0.0)
            rstd = lax.rsqrt(var + EPS)
            sc2 = g2_ref[...] * rstd
            sc2_ref[...] = sc2
            sh2_ref[...] = b2_ref[...] - mean * sc2

    head_spec = lambda shape: pl.BlockSpec(shape, lambda b, h: (h, 0, 0))
    const_vec = pl.BlockSpec((1, C), lambda b, h: (0, 0))

    return pl.pallas_call(
        kernel,
        out_shape=(jax.ShapeDtypeStruct((B, N, C), x.dtype),
                   jax.ShapeDtypeStruct((1, C), jnp.float32),
                   jax.ShapeDtypeStruct((1, C), jnp.float32)),
        grid_spec=pltpu.PrefetchScalarGridSpec(
            num_scalar_prefetch=0,
            grid=(B, num_heads),
            in_specs=[
                pl.BlockSpec((1, N, C), lambda b, h: (b, 0, 0)),   # x
                const_vec,                                         # scale1
                const_vec,                                         # shift1
                head_spec((1, C, hd)),                             # wq
                head_spec((1, C, hd)),                             # wk
                head_spec((1, C, hd)),                             # wv
                head_spec((1, 1, hd)),                             # bq
                head_spec((1, 1, hd)),                             # bk
                head_spec((1, 1, hd)),                             # bv
                head_spec((1, hd, C)),                             # wproj (per head)
                const_vec,                                         # bproj
                const_vec,                                         # gamma2
                const_vec,                                         # beta2
            ],
            out_specs=[
                pl.BlockSpec((1, N, C), lambda b, h: (b, 0, 0)),   # attention out
                const_vec,                                         # scale2
                const_vec,                                         # shift2
            ],
            scratch_shapes=[
                pltpu.VMEM((N, C), jnp.bfloat16),   # BN1-applied activations
                pltpu.VMEM((N, C), jnp.float32),    # output-projection accumulator
                pltpu.VMEM((1, C), jnp.float32),    # BN2 sum
                pltpu.VMEM((1, C), jnp.float32),    # BN2 sum of squares
            ],
        ),
        compiler_params=pltpu.CompilerParams(
            dimension_semantics=("arbitrary", "arbitrary"),
            vmem_limit_bytes=VMEM_LIMIT),
    )(x, scale1, shift1, wq, wk, wv, bq, bk, bv, wp, bproj, gamma2, beta2)


# ---------------------------------------------------------------------------
# Fused BN2-apply + MLP (hidden-chunked) + residual add
# ---------------------------------------------------------------------------
def mlp_residual(a2d, x2d, scale2, shift2, w1, b1, w2, b2):
    """a2d, x2d: (R, C).  w1: (C, H) bf16, w2: (H, C) bf16.
    Returns x + fc2(gelu(fc1(BN2(a))))."""
    R, C = a2d.shape
    H = w1.shape[1]
    tm = _row_tile(R, max_rows=512)
    th = _col_tile(H, max_cols=512)

    def kernel(a_ref, x_ref, sc_ref, sh_ref, w1_ref, b1_ref, w2_ref, b2_ref,
               o_ref, zb_sc, acc_sc):
        k = pl.program_id(1)

        @pl.when(k == 0)
        def _():
            acc_sc[...] = jnp.zeros_like(acc_sc)
            z = a_ref[...].astype(jnp.float32) * sc_ref[...] + sh_ref[...]
            zb_sc[...] = z.astype(jnp.bfloat16)

        hdn = jnp.dot(zb_sc[...], w1_ref[...],
                      preferred_element_type=jnp.float32) + b1_ref[...]
        # TODO(synk): torch nn.GELU() default is the exact erf form; tanh
        # approximation is used here (max abs deviation ~1e-3).
        hdn = jax.nn.gelu(hdn, approximate=True)
        acc_sc[...] += jnp.dot(hdn.astype(jnp.bfloat16), w2_ref[...],
                               preferred_element_type=jnp.float32)

        @pl.when(k == pl.num_programs(1) - 1)
        def _():
            y = acc_sc[...] + b2_ref[...]
            o_ref[...] = (x_ref[...].astype(jnp.float32) + y).astype(o_ref.dtype)

    return pl.pallas_call(
        kernel,
        out_shape=jax.ShapeDtypeStruct((R, C), x2d.dtype),
        grid_spec=pltpu.PrefetchScalarGridSpec(
            num_scalar_prefetch=0,
            grid=(R // tm, H // th),
            in_specs=[
                pl.BlockSpec((tm, C), lambda i, k: (i, 0)),
                pl.BlockSpec((tm, C), lambda i, k: (i, 0)),
                pl.BlockSpec((1, C), lambda i, k: (0, 0)),
                pl.BlockSpec((1, C), lambda i, k: (0, 0)),
                pl.BlockSpec((C, th), lambda i, k: (0, k)),
                pl.BlockSpec((1, th), lambda i, k: (0, k)),
                pl.BlockSpec((th, C), lambda i, k: (k, 0)),
                pl.BlockSpec((1, C), lambda i, k: (0, 0)),
            ],
            out_specs=pl.BlockSpec((tm, C), lambda i, k: (i, 0)),
            scratch_shapes=[
                pltpu.VMEM((tm, C), jnp.bfloat16),   # BN2-applied activations
                pltpu.VMEM((tm, C), jnp.float32),    # fc2 accumulator
            ],
        ),
        compiler_params=pltpu.CompilerParams(
            dimension_semantics=("parallel", "arbitrary"),
            vmem_limit_bytes=VMEM_LIMIT),
    )(a2d, x2d, scale2, shift2, w1, b1.reshape(1, H).astype(jnp.float32),
      w2, b2.reshape(1, C).astype(jnp.float32))


# ---------------------------------------------------------------------------
# Full Block_attention forward
# ---------------------------------------------------------------------------
def block_attention_forward(x, params, *, num_heads=8):
    B, N, C = x.shape
    hd = C // num_heads
    x2d = x.reshape(B * N, C)

    scale1, shift1 = bn_fold_stats(x2d, params["gamma1"], params["beta1"])

    # Weight preprocessing (XLA side, outside the kernels): heads-major slabs
    # so the kernel never slices the lane axis, and bf16 MXU operands.
    wqkv = params["wqkv"]
    bqkv = params["bqkv"]
    wq = wqkv[:, 0 * C:1 * C].reshape(C, num_heads, hd).transpose(1, 0, 2).astype(jnp.bfloat16)
    wk = wqkv[:, 1 * C:2 * C].reshape(C, num_heads, hd).transpose(1, 0, 2).astype(jnp.bfloat16)
    wv = wqkv[:, 2 * C:3 * C].reshape(C, num_heads, hd).transpose(1, 0, 2).astype(jnp.bfloat16)
    bq = bqkv[0 * C:1 * C].reshape(num_heads, 1, hd).astype(jnp.float32)
    bk = bqkv[1 * C:2 * C].reshape(num_heads, 1, hd).astype(jnp.float32)
    bv = bqkv[2 * C:3 * C].reshape(num_heads, 1, hd).astype(jnp.float32)
    wp = params["wproj"].reshape(num_heads, hd, C).astype(jnp.bfloat16)

    a, scale2, shift2 = attention_bn2(
        x, scale1, shift1, wq, wk, wv, bq, bk, bv, wp,
        params["bproj"].reshape(1, C).astype(jnp.float32),
        params["gamma2"].reshape(1, C).astype(jnp.float32),
        params["beta2"].reshape(1, C).astype(jnp.float32),
        num_heads=num_heads)

    a2d = a.reshape(B * N, C)
    y2d = mlp_residual(a2d, x2d, scale2, shift2,
                       params["w1"].astype(jnp.bfloat16), params["b1"],
                       params["w2"].astype(jnp.bfloat16), params["b2"])
    return y2d.reshape(B, N, C)


# ---------------------------------------------------------------------------
# Pure-JAX f32 reference (same semantics) for the self-check
# ---------------------------------------------------------------------------
def reference_forward(x, params, *, num_heads=8):
    B, N, C = x.shape

    def bn(z, g, b):
        mean = jnp.mean(z, axis=(0, 1), keepdims=True)
        var = jnp.mean((z - mean) ** 2, axis=(0, 1), keepdims=True)
        return (z - mean) / jnp.sqrt(var + EPS) * g + b

    z = bn(x, params["gamma1"], params["beta1"])
    qkv = z @ params["wqkv"] + params["bqkv"]
    hd = C // num_heads
    qkv = qkv.reshape(B, N, 3, num_heads, hd).transpose(2, 0, 3, 1, 4)
    q, k, v = qkv[0], qkv[1], qkv[2]
    attn = jnp.einsum("bhqd,bhkd->bhqk", q, k) * (float(hd) ** -0.5)
    attn = jax.nn.softmax(attn, axis=-1)
    o = jnp.einsum("bhqk,bhkd->bhqd", attn, v)
    o = o.transpose(0, 2, 1, 3).reshape(B, N, C)
    o = o @ params["wproj"] + params["bproj"]
    z2 = bn(o, params["gamma2"], params["beta2"])
    h = jax.nn.gelu(z2 @ params["w1"] + params["b1"], approximate=True)
    y = h @ params["w2"] + params["b2"]
    return x + y


if __name__ == "__main__":
    B, N, C = 2, 16, 32          # batch, seq, dim
    num_heads = 8
    hidden = int(C * 4.0)

    key = jax.random.PRNGKey(0)
    ks = jax.random.split(key, 13)
    x = jax.random.normal(ks[0], (B, N, C), dtype=jnp.float32)

    params = {
        "gamma1": 1.0 + 0.1 * jax.random.normal(ks[1], (C,), jnp.float32),
        "beta1": 0.1 * jax.random.normal(ks[2], (C,), jnp.float32),
        "gamma2": 1.0 + 0.1 * jax.random.normal(ks[3], (C,), jnp.float32),
        "beta2": 0.1 * jax.random.normal(ks[4], (C,), jnp.float32),
        "wqkv": jax.random.normal(ks[5], (C, 3 * C), jnp.float32) / jnp.sqrt(1.0 * C),
        "bqkv": 0.05 * jax.random.normal(ks[6], (3 * C,), jnp.float32),
        "wproj": jax.random.normal(ks[7], (C, C), jnp.float32) / jnp.sqrt(1.0 * C),
        "bproj": 0.05 * jax.random.normal(ks[8], (C,), jnp.float32),
        "w1": jax.random.normal(ks[9], (C, hidden), jnp.float32) / jnp.sqrt(1.0 * C),
        "b1": 0.05 * jax.random.normal(ks[10], (hidden,), jnp.float32),
        "w2": jax.random.normal(ks[11], (hidden, C), jnp.float32) / jnp.sqrt(1.0 * hidden),
        "b2": 0.05 * jax.random.normal(ks[12], (C,), jnp.float32),
    }

    out = block_attention_forward(x, params, num_heads=num_heads)
    out = jax.block_until_ready(out)

    ref = reference_forward(x, params, num_heads=num_heads)
    ref = jax.block_until_ready(ref)

    assert out.shape == (B, N, C)
    assert bool(jnp.all(jnp.isfinite(out))), "non-finite output"
    err = float(jnp.max(jnp.abs(out - ref)))
    # bf16 MXU operands vs f32 reference -> bf16-appropriate tolerance.
    assert jnp.allclose(out, ref, atol=7.5e-2, rtol=7.5e-2), \
        f"mismatch, max abs err={err}"

    print("KERNEL_OK")
</pallas_src>

<mosaic_0001>
module attributes {stable_mosaic.version = 11 : i64} {
  func.func @kernel(%arg0: i32, %arg1: memref<32x32xf32, #tpu.memory_space<vmem>>, %arg2: memref<1x32xf32, #tpu.memory_space<vmem>>, %arg3: memref<1x32xf32, #tpu.memory_space<vmem>>, %arg4: memref<1x32xf32, #tpu.memory_space<vmem>>, %arg5: memref<1x32xf32, #tpu.memory_space<vmem>>, %arg6: memref<1x32xf32, #tpu.memory_space<vmem>>, %arg7: memref<1x32xf32, #tpu.memory_space<vmem>>) attributes {dimension_semantics = [#tpu.dimension_semantics<arbitrary>], iteration_bounds = array<i64: 1>, scalar_prefetch = 0 : i64, scratch_operands = 2 : i64, tpu.core_type = #tpu.core_type<tc>, window_params = [{transform_indices = @transform_0, window_bounds = array<i64: 32, 32>}, {pipeline_mode = #tpu.pipeline_mode<synchronous>, transform_indices = @transform_1, window_bounds = array<i64: 1, 32>}, {pipeline_mode = #tpu.pipeline_mode<synchronous>, transform_indices = @transform_2, window_bounds = array<i64: 1, 32>}, {pipeline_mode = #tpu.pipeline_mode<synchronous>, transform_indices = @transform_3, window_bounds = array<i64: 1, 32>}, {pipeline_mode = #tpu.pipeline_mode<synchronous>, transform_indices = @transform_4, window_bounds = array<i64: 1, 32>}]} {
    %c0_i32 = arith.constant 0 : i32
    %0 = arith.cmpi eq, %arg0, %c0_i32 : i32
    %1 = arith.extui %0 : i1 to i32
    %c0_i32_0 = arith.constant 0 : i32
    %2 = arith.cmpi ne, %1, %c0_i32_0 : i32
    scf.if %2 {
      %cst_13 = arith.constant 0.000000e+00 : f32
      %18 = vector.broadcast %cst_13 : f32 to vector<1x32xf32>
      %c0_14 = arith.constant 0 : index
      %c0_15 = arith.constant 0 : index
      %19 = vector.load %arg6[%c0_14, %c0_15] : memref<1x32xf32, #tpu.memory_space<vmem>>, vector<1x32xf32>
      tpu.vector_store %arg6[%c0_14, %c0_15], %18 {strides = array<i32>} : memref<1x32xf32, #tpu.memory_space<vmem>>, vector<1x32xf32>,
      %cst_16 = arith.constant 0.000000e+00 : f32
      %20 = vector.broadcast %cst_16 : f32 to vector<1x32xf32>
      %c0_17 = arith.constant 0 : index
      %c0_18 = arith.constant 0 : index
      %21 = vector.load %arg7[%c0_17, %c0_18] : memref<1x32xf32, #tpu.memory_space<vmem>>, vector<1x32xf32>
      tpu.vector_store %arg7[%c0_17, %c0_18], %20 {strides = array<i32>} : memref<1x32xf32, #tpu.memory_space<vmem>>, vector<1x32xf32>,
    } else {
    }
    %c0 = arith.constant 0 : index
    %c0_1 = arith.constant 0 : index
    %3 = vector.load %arg1[%c0, %c0_1] : memref<32x32xf32, #tpu.memory_space<vmem>>, vector<32x32xf32>
    %c0_2 = arith.constant 0 : index
    %c0_3 = arith.constant 0 : index
    %4 = vector.load %arg6[%c0_2, %c0_3] : memref<1x32xf32, #tpu.memory_space<vmem>>, vector<1x32xf32>
    %cst = arith.constant dense<0.000000e+00> : vector<32xf32>
    %5 = vector.multi_reduction <add>, %3, %cst [0] : vector<32x32xf32> to vector<32xf32>
    %6 = vector.shape_cast %5 : vector<32xf32> to vector<1x32xf32>
    %7 = arith.addf %4, %6 : vector<1x32xf32>
    %c0_4 = arith.constant 0 : index
    %c0_5 = arith.constant 0 : index
    %8 = vector.load %arg6[%c0_4, %c0_5] : memref<1x32xf32, #tpu.memory_space<vmem>>, vector<1x32xf32>
    tpu.vector_store %arg6[%c0_4, %c0_5], %7 {strides = array<i32>} : memref<1x32xf32, #tpu.memory_space<vmem>>, vector<1x32xf32>,
    %c0_6 = arith.constant 0 : index
    %c0_7 = arith.constant 0 : index
    %9 = vector.load %arg7[%c0_6, %c0_7] : memref<1x32xf32, #tpu.memory_space<vmem>>, vector<1x32xf32>
    %10 = arith.mulf %3, %3 : vector<32x32xf32>
    %cst_8 = arith.constant dense<0.000000e+00> : vector<32xf32>
    %11 = vector.multi_reduction <add>, %10, %cst_8 [0] : vector<32x32xf32> to vector<32xf32>
    %12 = vector.shape_cast %11 : vector<32xf32> to vector<1x32xf32>
    %13 = arith.addf %9, %12 : vector<1x32xf32>
    %c0_9 = arith.constant 0 : index
    %c0_10 = arith.constant 0 : index
    %14 = vector.load %arg7[%c0_9, %c0_10] : memref<1x32xf32, #tpu.memory_space<vmem>>, vector<1x32xf32>
    tpu.vector_store %arg7[%c0_9, %c0_10], %13 {strides = array<i32>} : memref<1x32xf32, #tpu.memory_space<vmem>>, vector<1x32xf32>,
    %c0_i32_11 = arith.constant 0 : i32
    %15 = arith.cmpi eq, %arg0, %c0_i32_11 : i32
    %16 = arith.extui %15 : i1 to i32
    %c0_i32_12 = arith.constant 0 : i32
    %17 = arith.cmpi ne, %16, %c0_i32_12 : i32
    scf.if %17 {
      %c0_13 = arith.constant 0 : index
      %c0_14 = arith.constant 0 : index
      %18 = vector.load %arg6[%c0_13, %c0_14] : memref<1x32xf32, #tpu.memory_space<vmem>>, vector<1x32xf32>
      %cst_15 = arith.constant 3.125000e-02 : f32
      %19 = vector.broadcast %cst_15 : f32 to vector<1x32xf32>
      %20 = arith.mulf %18, %19 : vector<1x32xf32>
      %c0_16 = arith.constant 0 : index
      %c0_17 = arith.constant 0 : index
      %21 = vector.load %arg7[%c0_16, %c0_17] : memref<1x32xf32, #tpu.memory_space<vmem>>, vector<1x32xf32>
      %cst_18 = arith.constant 3.125000e-02 : f32
      %22 = vector.broadcast %cst_18 : f32 to vector<1x32xf32>
      %23 = arith.mulf %21, %22 : vector<1x32xf32>
      %24 = arith.mulf %20, %20 : vector<1x32xf32>
      %25 = arith.subf %23, %24 : vector<1x32xf32>
      %cst_19 = arith.constant 0.000000e+00 : f32
      %26 = vector.broadcast %cst_19 : f32 to vector<1x32xf32>
      %27 = arith.maximumf %25, %26 : vector<1x32xf32>
      %cst_20 = arith.constant 9.99999974E-6 : f32
      %28 = vector.broadcast %cst_20 : f32 to vector<1x32xf32>
      %29 = arith.addf %27, %28 : vector<1x32xf32>
      %30 = math.rsqrt %29 : vector<1x32xf32>
      %c0_21 = arith.constant 0 : index
      %c0_22 = arith.constant 0 : index
      %31 = vector.load %arg2[%c0_21, %c0_22] : memref<1x32xf32, #tpu.memory_space<vmem>>, vector<1x32xf32>
      %32 = arith.mulf %31, %30 : vector<1x32xf32>
      %c0_23 = arith.constant 0 : index
      %c0_24 = arith.constant 0 : index
      %33 = vector.load %arg4[%c0_23, %c0_24] : memref<1x32xf32, #tpu.memory_space<vmem>>, vector<1x32xf32>
      tpu.vector_store %arg4[%c0_23, %c0_24], %32 {strides = array<i32>} : memref<1x32xf32, #tpu.memory_space<vmem>>, vector<1x32xf32>,
      %c0_25 = arith.constant 0 : index
      %c0_26 = arith.constant 0 : index
      %34 = vector.load %arg3[%c0_25, %c0_26] : memref<1x32xf32, #tpu.memory_space<vmem>>, vector<1x32xf32>
      %35 = arith.mulf %20, %32 : vector<1x32xf32>
      %36 = arith.subf %34, %35 : vector<1x32xf32>
      %c0_27 = arith.constant 0 : index
      %c0_28 = arith.constant 0 : index
      %37 = vector.load %arg5[%c0_27, %c0_28] : memref<1x32xf32, #tpu.memory_space<vmem>>, vector<1x32xf32>
      tpu.vector_store %arg5[%c0_27, %c0_28], %36 {strides = array<i32>} : memref<1x32xf32, #tpu.memory_space<vmem>>, vector<1x32xf32>,
    } else {
    }
    return
  }
  func.func @transform_0(%arg0: i32) -> (i32, i32) {
    %c0_i32 = arith.constant 0 : i32
    %c0_i32_0 = arith.constant 0 : i32
    return %arg0, %c0_i32 : i32, i32
  }
  func.func @transform_1(%arg0: i32) -> (i32, i32) {
    %c0_i32 = arith.constant 0 : i32
    %c0_i32_0 = arith.constant 0 : i32
    %c0_i32_1 = arith.constant 0 : i32
    return %c0_i32, %c0_i32_0 : i32, i32
  }
  func.func @transform_2(%arg0: i32) -> (i32, i32) {
    %c0_i32 = arith.constant 0 : i32
    %c0_i32_0 = arith.constant 0 : i32
    %c0_i32_1 = arith.constant 0 : i32
    return %c0_i32, %c0_i32_0 : i32, i32
  }
  func.func @transform_3(%arg0: i32) -> (i32, i32) {
    %c0_i32 = arith.constant 0 : i32
    %c0_i32_0 = arith.constant 0 : i32
    %c0_i32_1 = arith.constant 0 : i32
    return %c0_i32, %c0_i32_0 : i32, i32
  }
  func.func @transform_4(%arg0: i32) -> (i32, i32) {
    %c0_i32 = arith.constant 0 : i32
    %c0_i32_0 = arith.constant 0 : i32
    %c0_i32_1 = arith.constant 0 : i32
    return %c0_i32, %c0_i32_0 : i32, i32
  }
}

</mosaic_0001>

<bundles_post_ra>
// kernel: tpu_custom_call.1
= control target key start
LH: loop header
LB: loop body
LE: loop exit
PB: predicated region body
PF: predicated region fallthrough
CT: control target
= control target key end

     0   :  { %10 = vsyncpa [#allocation5], 0  ;;  %s296_s0 = inlined_call_operand.hbm [shape: f32[32,32], index: 0, kind: input, shape index: {}]   ;;  %s297_s1 = inlined_call_operand.vmem [shape: f32[1,32], index: 1, kind: input, shape index: {}]   ;;  %s298_s2 = inlined_call_operand.vmem [shape: f32[1,32], index: 2, kind: input, shape index: {}]   ;;  %s299_s3 = inlined_call_operand.hbm [shape: f32[1,32], index: 3, kind: output, shape index: {0}]   ;;  %s300_s4 = inlined_call_operand.hbm [shape: f32[1,32], index: 4, kind: output, shape index: {1}]  }
   0x1   :  { %11 = vsyncpa [#allocation6], 0 }
   0x2   :  { %12 = vsyncpa [#allocation9], 0  ;;  %s209_s15 = smov [#allocation4]   ;;  %s137_s19 = scalar_lea.hbm %s296_s0, 512 }
   0x3   :  { %s18_s16 = sshll.u32 %s209_s15, 4  ;;  %p138_p0 = scmp.ne.s32.totalorder %s296_s0, %s137_s19  ;;  %s19_s16 = int_to_ptr.vmem [resolvable:$true] %s18_s16 }
   0x4   :  { %p141_p1 = scmp.lt.u32.totalorder %s137_s19, %s296_s0 }
   0x6   :  { %p143_p2 = pnand %p141_p1, %p138_p0 }
   0x8   :  { %146 = shalt.err (!%p143_p2)
}
   0x9   :  { %s147_s24 = scalar_lea.vmem %s19_s16, 512  ;;  %p152_p4 = scmp.lt.s32.totalorder %s19_s16, %s19_s16 }
   0xa   :  { %p148_p3 = scmp.ne.s32.totalorder %s19_s16, %s147_s24  ;;  %p153_p5 = scmp.lt.s32.totalorder %s147_s24, %s147_s24 }
   0xc   :  { %p154_p6 = por %p153_p5, %p152_p4 }
   0xe   :  { %p155_p7 = pnand %p154_p6, %p148_p3 }
  0x10   :  { %158 = shalt.err (!%p155_p7)
}
  0x11   :  { %s210_s25 = smov 128   ;;  %s211_s26 = smov 8  }
  0x12   :  { %24 = dma.hbm_to_vmem [thread:$0]  %s296_s0, 512, %s19_s16, [#allocation5], %s210_s25, %s210_s25, %s211_s26  }
  0x13   :  { %203 = dma.done.wait [#allocation5], 512  }
  0x14   :  { %204 = vsyncadd [#allocation5], 4294966784  ;;  %vm36_vm0 = vcmask 253952   ;;  %v212_v0 = vmov 0.0   ;;  %vm44_vm1 = vcmask 261120   ;;  %v39_v1 = vld [vmem:[#allocation4] sm:$0xff] }
  0x15   :  { %37 = vst.msk [vmem:[#allocation2] sm:$0x1] %vm36_vm0, %v212_v0  ;;  %38 = vst.msk [vmem:[#allocation3] sm:$0x1] %vm36_vm0, %v212_v0  ;;  %v40_v2 = vld [vmem:[#allocation4 + $0x8] sm:$0xff]  ;;  %v41_v3 = vld [vmem:[#allocation4 + $0x10] sm:$0xff]  ;;  %v62_v8 = vmul.f32 %v39_v1, %v39_v1 }
  0x16   :  { %v42_v4 = vld [vmem:[#allocation4 + $0x18] sm:$0xff]  ;;  %v45_v5 = vsel %vm44_vm1, %v39_v1, 0.0  ;;  %v46_v6 = vsel %vm44_vm1, %v40_v2, 0.0  ;;  %v48_v7 = vsel %vm44_vm1, %v41_v3, 0.0  ;;  %v63_v10 = vmul.f32 %v40_v2, %v40_v2  ;;  %s213_s30 = smov [#allocation7]   ;;  %s214_s8 = smov [#allocation8]  }
  0x17   :  { %v47_v9 = vadd.f32 %v46_v6, %v45_v5  ;;  %v64_v11 = vmul.f32 %v41_v3, %v41_v3  ;;  %v50_v12 = vsel %vm44_vm1, %v42_v4, 0.0  ;;  %v65_v13 = vmul.f32 %v42_v4, %v42_v4  ;;  %v93_v47 = vld [vmem:[%s297_s1] sm:$0x1]  ;;  %s106_s5 = sshll.u32 %s213_s30, 4  ;;  %s116_s9 = sshll.u32 %s214_s8, 4  ;;  %s107_s5 = int_to_ptr.vmem [resolvable:$true] %s106_s5  ;;  %s117_s9 = int_to_ptr.vmem [resolvable:$true] %s116_s9 }
  0x18   :  { %v66_v14 = vsel %vm44_vm1, %v62_v8, 0.0  ;;  %v67_v16 = vsel %vm44_vm1, %v63_v10, 0.0  ;;  %v96_v50 = vld [vmem:[%s298_s2] sm:$0x1]  ;;  %s159_s10 = scalar_lea.vmem %s107_s5, 16  ;;  %s163_s11 = scalar_lea.vmem %s107_s5, 32 }
  0x19   :  { %v49_v15 = vadd.f32 %v48_v7, %v47_v9  ;;  %v69_v17 = vsel %vm44_vm1, %v64_v11, 0.0  ;;  %v68_v18 = vadd.f32 %v67_v16, %v66_v14  ;;  %v71_v20 = vsel %vm44_vm1, %v65_v13, 0.0  ;;  %p160_p8 = scmp.ne.s32.totalorder %s107_s5, %s159_s10  ;;  %p164_p9 = scmp.lt.s32.totalorder %s107_s5, %s107_s5 }
  0x1a   :  { %p165_p10 = scmp.lt.s32.totalorder %s163_s11, %s159_s10 }
  0x1b   :  { %v51_v19 = vadd.f32 %v50_v12, %v49_v15  ;;  %v70_v21 = vadd.f32 %v69_v17, %v68_v18 }
  0x1c   :  { %v43_v31 = vld [vmem:[#allocation2] sm:$0x1]  ;;  %v61_v36 = vld [vmem:[#allocation3] sm:$0x1]  ;;  %p166_p11 = por %p165_p10, %p164_p9 }
  0x1d   :  { %v52_v22 = vrot.slane %v51_v19, 4  ;;  %v72_v23 = vadd.f32 %v71_v20, %v70_v21 }
  0x1e   :  { %p167_p12 = pnand %p166_p11, %p160_p8 }
  0x1f   :  { %v53_v24 = vadd.f32 %v52_v22, %v51_v19  ;;  %v73_v25 = vrot.slane %v72_v23, 4 }
  0x21   :  { %v54_v26 = vrot.slane %v53_v24, 2  ;;  %v74_v27 = vadd.f32 %v73_v25, %v72_v23 }
  0x23   :  { %v55_v28 = vadd.f32 %v54_v26, %v53_v24  ;;  %v75_v29 = vrot.slane %v74_v27, 2 }
  0x25   :  { %v56_v30 = vrot.slane %v55_v28, 1  ;;  %v76_v32 = vadd.f32 %v75_v29, %v74_v27 }
  0x27   :  { %v57_v33 = vadd.f32 %v56_v30, %v55_v28  ;;  %v77_v34 = vrot.slane %v76_v32, 1 }
  0x29   :  { %v58_v35 = vadd.f32 %v57_v33, %v43_v31  ;;  %v78_v37 = vadd.f32 %v77_v34, %v76_v32 }
  0x2b   :  { %60 = vst.msk [vmem:[#allocation2] sm:$0x1] %vm36_vm0, %v58_v35  ;;  %v79_v38 = vadd.f32 %v78_v37, %v61_v36 }
  0x2d   :  { %80 = vst.msk [vmem:[#allocation3] sm:$0x1] %vm36_vm0, %v79_v38 }
  0x32   :  { %v84_v39 = vld [vmem:[#allocation2] sm:$0x1] }
  0x33   :  { %v85_v40 = vmul.f32 0.03125, %v84_v39 }
  0x34   :  { %v86_v41 = vld [vmem:[#allocation3] sm:$0x1] }
  0x35   :  { %v88_v42 = vmul.f32 %v85_v40, %v85_v40  ;;  %v87_v43 = vmul.f32 0.03125, %v86_v41 }
  0x37   :  { %v89_v44 = vsub.f32 %v87_v43, %v88_v42 }
  0x39   :  { %v90_v45 = vmax.f32 %v89_v44, 0.0 }
  0x3b   :  { %v91_v46 = vadd.f32 1e-05, %v90_v45 }
  0x3d   :  { %135 = vrsqrt.f32 %v91_v46 }
  0x47   :  { %v136_v48 = vpop.eup %135 }
  0x48   :  { %v94_v49 = vmul.f32 %v136_v48, %v93_v47 }
  0x4a   :  { %95 = vst.msk [vmem:[#allocation7] sm:$0x1] %vm36_vm0, %v94_v49  ;;  %v97_v51 = vmul.f32 %v94_v49, %v85_v40 }
  0x4b   :  { %170 = shalt.err (!%p167_p12)
}
  0x4c   :  { %s171_s13 = scalar_lea.hbm %s299_s3, 16 }
  0x4d   :  { %p172_p13 = scmp.ne.s32.totalorder %s299_s3, %s171_s13  ;;  %p175_p0 = scmp.lt.u32.totalorder %s171_s13, %s299_s3 }
  0x4f   :  { %p177_p1 = pnand %p175_p0, %p172_p13 }
  0x51   :  { %180 = shalt.err (!%p177_p1)
}
  0x52   :  { %109 = dma.vmem_to_hbm [thread:$0]  %s107_s5, 16, %s299_s3, [#allocation6]   ;;  %v98_v52 = vsub.f32 %v96_v50, %v97_v51 }
  0x53   :  { %s181_s19 = scalar_lea.vmem %s117_s9, 16  ;;  %s185_s20 = scalar_lea.vmem %s117_s9, 32 }
  0x54   :  { %99 = vst.msk [vmem:[#allocation8] sm:$0x1] %vm36_vm0, %v98_v52  ;;  %p182_p2 = scmp.ne.s32.totalorder %s117_s9, %s181_s19  ;;  %p186_p3 = scmp.lt.s32.totalorder %s117_s9, %s117_s9 }
  0x55   :  { %p187_p4 = scmp.lt.s32.totalorder %s185_s20, %s181_s19 }
  0x57   :  { %p188_p5 = por %p187_p4, %p186_p3 }
  0x59   :  { %p189_p6 = pnand %p188_p5, %p182_p2 }
  0x5b   :  { %192 = shalt.err (!%p189_p6)
}
  0x5c   :  { %s193_s23 = scalar_lea.hbm %s300_s4, 16 }
  0x5d   :  { %p194_p7 = scmp.ne.s32.totalorder %s300_s4, %s193_s23  ;;  %p197_p8 = scmp.lt.u32.totalorder %s193_s23, %s300_s4 }
  0x5f   :  { %p199_p9 = pnand %p197_p8, %p194_p7 }
  0x61   :  { %202 = shalt.err (!%p199_p9)
}
  0x62   :  { %119 = dma.vmem_to_hbm [thread:$0]  %s117_s9, 16, %s300_s4, [#allocation9]  }
  0x63   :  { %205 = dma.done.wait [#allocation6], 16  }
  0x64   :  { %206 = vsyncadd [#allocation6], 4294967280 }
  0x65   :  { %207 = dma.done.wait [#allocation9], 16  }
  0x66   :  { %208 = vsyncadd [#allocation9], 4294967280 }
  0x67   :  { %126 = vsyncpa [#allocation5], 1 }
  0x68   :  { %127 = vsyncpa [#allocation6], 1 }
  0x69   :  { %128 = vsyncpa [#allocation9], 1 }

</bundles_post_ra>
